<compile_context>
chip_gen: v5e
topology: v5e:2x2
jax: 0.10.0
libtpu: 0.0.40
codegen_flags: <defaults>
</compile_context>

<pallas_src>
import functools

import jax
import jax.numpy as jnp
from jax.experimental import pallas as pl
from jax.experimental.pallas import tpu as pltpu


def _lstm_kernel(x2d_ref, w_ih_ref, w_hh_ref, b_ref, w_head_ref, b_head_ref,
                 out_ref, *, seq_len, batch, hidden_size, out_size):
    T, B, H = seq_len, batch, hidden_size

    # --- One-shot input projection for all T timesteps (bias folded in). ---
    # IN == 1, so x @ W_ih^T is an outer product: VPU broadcast multiply
    # instead of a K=1 MXU dot.  (T*B, 1) * (1, 4H) + (1, 4H) -> (T*B, 4H).
    # Stays in registers; no VMEM scratch.
    xproj = x2d_ref[...] * w_ih_ref[...] + b_ref[...]

    # Hoist loop-invariant recurrent weight into registers.
    w_hh = w_hh_ref[...]                                   # (H, 4H)

    h = jnp.zeros((B, H), jnp.float32)
    c = jnp.zeros((B, H), jnp.float32)

    # Fully unrolled recurrence (T static & small): h/c carried as register
    # values, xproj consumed via static sublane-aligned slices.
    for t in range(T):
        gx = xproj[t * B:(t + 1) * B, :]                   # (B, 4H), static slice
        gates = gx + jnp.dot(h, w_hh, preferred_element_type=jnp.float32)
        # Full-vreg nonlinearities: 2 EUP pushes on (B, 4H), then lane slices.
        sg = jax.nn.sigmoid(gates)
        tg = jnp.tanh(gates)
        i_g = sg[:, 0 * H:1 * H]
        f_g = sg[:, 1 * H:2 * H]
        g_g = tg[:, 2 * H:3 * H]
        o_g = sg[:, 3 * H:4 * H]
        c = f_g * c + i_g * g_g
        h = o_g * jnp.tanh(c)

    # --- Fused heads: single (B, 2*OUT) matmul, two softmaxes, two stores. ---
    z = (jnp.dot(h, w_head_ref[...], preferred_element_type=jnp.float32)
         + b_head_ref[...])                                # (B, 2*OUT)

    def _softmax(v):
        v = v - jnp.max(v, axis=-1, keepdims=True)
        e = jnp.exp(v)
        # Exact divide kept for strict parity with nn.Softmax.
        return e / jnp.sum(e, axis=-1, keepdims=True)

    out_ref[:, 0:out_size] = _softmax(z[:, 0:out_size])
    out_ref[:, out_size:2 * out_size] = _softmax(z[:, out_size:2 * out_size])


def lstm_module_forward(x, params):
    """x: (T, B, IN) float32 (batch_first=False). Returns (out1, out2), each (B, OUT)."""
    T, B, IN = x.shape
    H = params["w_hh_t"].shape[0]
    OUT = params["w1_t"].shape[1]

    # Pad batch up to a full sublane group (multiple of 8) so every (B, .)
    # tile inside the kernel is an unmasked 8-sublane tile. Padded rows run
    # the LSTM on zeros and are discarded afterwards.
    Bp = ((B + 7) // 8) * 8
    x_p = jnp.pad(x, ((0, 0), (0, Bp - B), (0, 0)))

    # Wrapper-side (free) layout prep: flatten time into rows, fuse the heads.
    x2d = x_p.reshape(T * Bp, IN)
    w_head = jnp.concatenate([params["w1_t"], params["w2_t"]], axis=1)  # (H, 2*OUT)
    b_head = jnp.concatenate([params["b1"], params["b2"]], axis=1)      # (1, 2*OUT)

    kernel = functools.partial(_lstm_kernel, seq_len=T, batch=Bp,
                               hidden_size=H, out_size=OUT)

    out = pl.pallas_call(
        kernel,
        out_shape=jax.ShapeDtypeStruct((Bp, 2 * OUT), jnp.float32),
        in_specs=[pl.BlockSpec(memory_space=pltpu.MemorySpace.VMEM)] * 6,
        out_specs=pl.BlockSpec(memory_space=pltpu.MemorySpace.VMEM),
    )(x2d, params["w_ih_t"], params["w_hh_t"], params["b"], w_head, b_head)

    return out[:B, :OUT], out[:B, OUT:]


def init_params(key, input_size=1, hidden_size=32, out_size=6):
    """Deterministic init, shapes matching nn.LSTM / nn.Linear."""
    H = hidden_size
    k_lstm = 1.0 / jnp.sqrt(H)
    keys = jax.random.split(key, 10)
    w_ih = jax.random.uniform(keys[0], (4 * H, input_size), jnp.float32,
                              -k_lstm, k_lstm)
    w_hh = jax.random.uniform(keys[1], (4 * H, H), jnp.float32, -k_lstm, k_lstm)
    b_ih = jax.random.uniform(keys[2], (4 * H,), jnp.float32, -k_lstm, k_lstm)
    b_hh = jax.random.uniform(keys[3], (4 * H,), jnp.float32, -k_lstm, k_lstm)
    k_lin = 1.0 / jnp.sqrt(H)
    w1 = jax.random.uniform(keys[4], (out_size, H), jnp.float32, -k_lin, k_lin)
    b1 = jax.random.uniform(keys[5], (out_size,), jnp.float32, -k_lin, k_lin)
    w2 = jax.random.uniform(keys[6], (out_size, H), jnp.float32, -k_lin, k_lin)
    b2 = jax.random.uniform(keys[7], (out_size,), jnp.float32, -k_lin, k_lin)
    return {
        "w_ih_t": w_ih.T,                      # (IN, 4H)
        "w_hh_t": w_hh.T,                      # (H, 4H)
        "b": (b_ih + b_hh)[None, :],           # (1, 4H)
        "w1_t": w1.T,                          # (H, OUT)
        "b1": b1[None, :],                     # (1, OUT)
        "w2_t": w2.T,                          # (H, OUT)
        "b2": b2[None, :],                     # (1, OUT)
    }


def reference_forward(x, p):
    T, B, _ = x.shape
    H = p["w_hh_t"].shape[0]
    h = jnp.zeros((B, H), jnp.float32)
    c = jnp.zeros((B, H), jnp.float32)
    for t in range(T):
        gates = x[t] @ p["w_ih_t"] + h @ p["w_hh_t"] + p["b"][0]
        i = jax.nn.sigmoid(gates[:, :H])
        f = jax.nn.sigmoid(gates[:, H:2 * H])
        g = jnp.tanh(gates[:, 2 * H:3 * H])
        o = jax.nn.sigmoid(gates[:, 3 * H:])
        c = f * c + i * g
        h = o * jnp.tanh(c)
    o1 = jax.nn.softmax(h @ p["w1_t"] + p["b1"][0], axis=-1)
    o2 = jax.nn.softmax(h @ p["w2_t"] + p["b2"][0], axis=-1)
    return o1, o2


if __name__ == "__main__":
    T, B, IN, H, OUT = 8, 2, 1, 32, 6
    key = jax.random.PRNGKey(0)
    kx, kp = jax.random.split(key)
    x = jax.random.normal(kx, (T, B, IN), jnp.float32)
    params = init_params(kp, input_size=IN, hidden_size=H, out_size=OUT)

    out1, out2 = lstm_module_forward(x, params)
    out1 = jax.block_until_ready(out1)
    out2 = jax.block_until_ready(out2)

    ref1, ref2 = reference_forward(x, params)
    assert jnp.allclose(out1, ref1, atol=1e-5, rtol=1e-5)
    assert jnp.allclose(out2, ref2, atol=1e-5, rtol=1e-5)

    print("KERNEL_OK")
</pallas_src>

<mosaic_0001>
module attributes {stable_mosaic.version = 11 : i64} {
  func.func @_lstm_kernel(%arg0: memref<64x1xf32, #tpu.memory_space<vmem>>, %arg1: memref<1x128xf32, #tpu.memory_space<vmem>>, %arg2: memref<32x128xf32, #tpu.memory_space<vmem>>, %arg3: memref<1x128xf32, #tpu.memory_space<vmem>>, %arg4: memref<32x12xf32, #tpu.memory_space<vmem>>, %arg5: memref<1x12xf32, #tpu.memory_space<vmem>>, %arg6: memref<8x12xf32, #tpu.memory_space<vmem>>) attributes {dimension_semantics = [], scalar_prefetch = 0 : i64, scratch_operands = 0 : i64, tpu.core_type = #tpu.core_type<tc>} {
    %c0 = arith.constant 0 : index
    %c0_0 = arith.constant 0 : index
    %0 = vector.load %arg0[%c0, %c0_0] : memref<64x1xf32, #tpu.memory_space<vmem>>, vector<64x1xf32>
    %c0_1 = arith.constant 0 : index
    %c0_2 = arith.constant 0 : index
    %1 = vector.load %arg1[%c0_1, %c0_2] : memref<1x128xf32, #tpu.memory_space<vmem>>, vector<1x128xf32>
    %2 = vector.broadcast %0 : vector<64x1xf32> to vector<64x128xf32>
    %3 = vector.broadcast %1 : vector<1x128xf32> to vector<64x128xf32>
    %4 = arith.mulf %2, %3 : vector<64x128xf32>
    %c0_3 = arith.constant 0 : index
    %c0_4 = arith.constant 0 : index
    %5 = vector.load %arg3[%c0_3, %c0_4] : memref<1x128xf32, #tpu.memory_space<vmem>>, vector<1x128xf32>
    %6 = vector.broadcast %5 : vector<1x128xf32> to vector<64x128xf32>
    %7 = arith.addf %4, %6 : vector<64x128xf32>
    %c0_5 = arith.constant 0 : index
    %c0_6 = arith.constant 0 : index
    %8 = vector.load %arg2[%c0_5, %c0_6] : memref<32x128xf32, #tpu.memory_space<vmem>>, vector<32x128xf32>
    %cst = arith.constant 0.000000e+00 : f32
    %9 = vector.broadcast %cst : f32 to vector<8x32xf32>
    %cst_7 = arith.constant 0.000000e+00 : f32
    %10 = vector.broadcast %cst_7 : f32 to vector<8x32xf32>
    %11 = vector.extract_strided_slice %7 {offsets = [0, 0], sizes = [8, 128], strides = [1, 1]} : vector<64x128xf32> to vector<8x128xf32>
    %cst_8 = arith.constant dense<0.000000e+00> : vector<8x128xf32>
    %12 = tpu.matmul %9, %8, %cst_8 {dimension_numbers = #tpu.dot_dimension_numbers<[1], [0], [0], [1], [0, 0, 1, 1], [], []>} : vector<8x32xf32>, vector<32x128xf32>, vector<8x128xf32> -> vector<8x128xf32>
    %13 = arith.addf %11, %12 : vector<8x128xf32>
    %14 = arith.negf %13 : vector<8x128xf32>
    %15 = math.exp %14 : vector<8x128xf32>
    %cst_9 = arith.constant 1.000000e+00 : f32
    %16 = vector.broadcast %cst_9 : f32 to vector<8x128xf32>
    %17 = arith.addf %16, %15 : vector<8x128xf32>
    %18 = arith.divf %16, %17 : vector<8x128xf32>
    %19 = math.tanh %13 : vector<8x128xf32>
    %20 = vector.extract_strided_slice %18 {offsets = [0, 0], sizes = [8, 32], strides = [1, 1]} : vector<8x128xf32> to vector<8x32xf32>
    %21 = vector.extract_strided_slice %18 {offsets = [0, 32], sizes = [8, 32], strides = [1, 1]} : vector<8x128xf32> to vector<8x32xf32>
    %22 = vector.extract_strided_slice %19 {offsets = [0, 64], sizes = [8, 32], strides = [1, 1]} : vector<8x128xf32> to vector<8x32xf32>
    %23 = vector.extract_strided_slice %18 {offsets = [0, 96], sizes = [8, 32], strides = [1, 1]} : vector<8x128xf32> to vector<8x32xf32>
    %24 = arith.mulf %21, %10 : vector<8x32xf32>
    %25 = arith.mulf %20, %22 : vector<8x32xf32>
    %26 = arith.addf %24, %25 : vector<8x32xf32>
    %27 = math.tanh %26 : vector<8x32xf32>
    %28 = arith.mulf %23, %27 : vector<8x32xf32>
    %29 = vector.extract_strided_slice %7 {offsets = [8, 0], sizes = [8, 128], strides = [1, 1]} : vector<64x128xf32> to vector<8x128xf32>
    %cst_10 = arith.constant dense<0.000000e+00> : vector<8x128xf32>
    %30 = tpu.matmul %28, %8, %cst_10 {dimension_numbers = #tpu.dot_dimension_numbers<[1], [0], [0], [1], [0, 0, 1, 1], [], []>} : vector<8x32xf32>, vector<32x128xf32>, vector<8x128xf32> -> vector<8x128xf32>
    %31 = arith.addf %29, %30 : vector<8x128xf32>
    %32 = arith.negf %31 : vector<8x128xf32>
    %33 = math.exp %32 : vector<8x128xf32>
    %cst_11 = arith.constant 1.000000e+00 : f32
    %34 = vector.broadcast %cst_11 : f32 to vector<8x128xf32>
    %35 = arith.addf %34, %33 : vector<8x128xf32>
    %36 = arith.divf %34, %35 : vector<8x128xf32>
    %37 = math.tanh %31 : vector<8x128xf32>
    %38 = vector.extract_strided_slice %36 {offsets = [0, 0], sizes = [8, 32], strides = [1, 1]} : vector<8x128xf32> to vector<8x32xf32>
    %39 = vector.extract_strided_slice %36 {offsets = [0, 32], sizes = [8, 32], strides = [1, 1]} : vector<8x128xf32> to vector<8x32xf32>
    %40 = vector.extract_strided_slice %37 {offsets = [0, 64], sizes = [8, 32], strides = [1, 1]} : vector<8x128xf32> to vector<8x32xf32>
    %41 = vector.extract_strided_slice %36 {offsets = [0, 96], sizes = [8, 32], strides = [1, 1]} : vector<8x128xf32> to vector<8x32xf32>
    %42 = arith.mulf %39, %26 : vector<8x32xf32>
    %43 = arith.mulf %38, %40 : vector<8x32xf32>
    %44 = arith.addf %42, %43 : vector<8x32xf32>
    %45 = math.tanh %44 : vector<8x32xf32>
    %46 = arith.mulf %41, %45 : vector<8x32xf32>
    %47 = vector.extract_strided_slice %7 {offsets = [16, 0], sizes = [8, 128], strides = [1, 1]} : vector<64x128xf32> to vector<8x128xf32>
    %cst_12 = arith.constant dense<0.000000e+00> : vector<8x128xf32>
    %48 = tpu.matmul %46, %8, %cst_12 {dimension_numbers = #tpu.dot_dimension_numbers<[1], [0], [0], [1], [0, 0, 1, 1], [], []>} : vector<8x32xf32>, vector<32x128xf32>, vector<8x128xf32> -> vector<8x128xf32>
    %49 = arith.addf %47, %48 : vector<8x128xf32>
    %50 = arith.negf %49 : vector<8x128xf32>
    %51 = math.exp %50 : vector<8x128xf32>
    %cst_13 = arith.constant 1.000000e+00 : f32
    %52 = vector.broadcast %cst_13 : f32 to vector<8x128xf32>
    %53 = arith.addf %52, %51 : vector<8x128xf32>
    %54 = arith.divf %52, %53 : vector<8x128xf32>
    %55 = math.tanh %49 : vector<8x128xf32>
    %56 = vector.extract_strided_slice %54 {offsets = [0, 0], sizes = [8, 32], strides = [1, 1]} : vector<8x128xf32> to vector<8x32xf32>
    %57 = vector.extract_strided_slice %54 {offsets = [0, 32], sizes = [8, 32], strides = [1, 1]} : vector<8x128xf32> to vector<8x32xf32>
    %58 = vector.extract_strided_slice %55 {offsets = [0, 64], sizes = [8, 32], strides = [1, 1]} : vector<8x128xf32> to vector<8x32xf32>
    %59 = vector.extract_strided_slice %54 {offsets = [0, 96], sizes = [8, 32], strides = [1, 1]} : vector<8x128xf32> to vector<8x32xf32>
    %60 = arith.mulf %57, %44 : vector<8x32xf32>
    %61 = arith.mulf %56, %58 : vector<8x32xf32>
    %62 = arith.addf %60, %61 : vector<8x32xf32>
    %63 = math.tanh %62 : vector<8x32xf32>
    %64 = arith.mulf %59, %63 : vector<8x32xf32>
    %65 = vector.extract_strided_slice %7 {offsets = [24, 0], sizes = [8, 128], strides = [1, 1]} : vector<64x128xf32> to vector<8x128xf32>
    %cst_14 = arith.constant dense<0.000000e+00> : vector<8x128xf32>
    %66 = tpu.matmul %64, %8, %cst_14 {dimension_numbers = #tpu.dot_dimension_numbers<[1], [0], [0], [1], [0, 0, 1, 1], [], []>} : vector<8x32xf32>, vector<32x128xf32>, vector<8x128xf32> -> vector<8x128xf32>
    %67 = arith.addf %65, %66 : vector<8x128xf32>
    %68 = arith.negf %67 : vector<8x128xf32>
    %69 = math.exp %68 : vector<8x128xf32>
    %cst_15 = arith.constant 1.000000e+00 : f32
    %70 = vector.broadcast %cst_15 : f32 to vector<8x128xf32>
    %71 = arith.addf %70, %69 : vector<8x128xf32>
    %72 = arith.divf %70, %71 : vector<8x128xf32>
    %73 = math.tanh %67 : vector<8x128xf32>
    %74 = vector.extract_strided_slice %72 {offsets = [0, 0], sizes = [8, 32], strides = [1, 1]} : vector<8x128xf32> to vector<8x32xf32>
    %75 = vector.extract_strided_slice %72 {offsets = [0, 32], sizes = [8, 32], strides = [1, 1]} : vector<8x128xf32> to vector<8x32xf32>
    %76 = vector.extract_strided_slice %73 {offsets = [0, 64], sizes = [8, 32], strides = [1, 1]} : vector<8x128xf32> to vector<8x32xf32>
    %77 = vector.extract_strided_slice %72 {offsets = [0, 96], sizes = [8, 32], strides = [1, 1]} : vector<8x128xf32> to vector<8x32xf32>
    %78 = arith.mulf %75, %62 : vector<8x32xf32>
    %79 = arith.mulf %74, %76 : vector<8x32xf32>
    %80 = arith.addf %78, %79 : vector<8x32xf32>
    %81 = math.tanh %80 : vector<8x32xf32>
    %82 = arith.mulf %77, %81 : vector<8x32xf32>
    %83 = vector.extract_strided_slice %7 {offsets = [32, 0], sizes = [8, 128], strides = [1, 1]} : vector<64x128xf32> to vector<8x128xf32>
    %cst_16 = arith.constant dense<0.000000e+00> : vector<8x128xf32>
    %84 = tpu.matmul %82, %8, %cst_16 {dimension_numbers = #tpu.dot_dimension_numbers<[1], [0], [0], [1], [0, 0, 1, 1], [], []>} : vector<8x32xf32>, vector<32x128xf32>, vector<8x128xf32> -> vector<8x128xf32>
    %85 = arith.addf %83, %84 : vector<8x128xf32>
    %86 = arith.negf %85 : vector<8x128xf32>
    %87 = math.exp %86 : vector<8x128xf32>
    %cst_17 = arith.constant 1.000000e+00 : f32
    %88 = vector.broadcast %cst_17 : f32 to vector<8x128xf32>
    %89 = arith.addf %88, %87 : vector<8x128xf32>
    %90 = arith.divf %88, %89 : vector<8x128xf32>
    %91 = math.tanh %85 : vector<8x128xf32>
    %92 = vector.extract_strided_slice %90 {offsets = [0, 0], sizes = [8, 32], strides = [1, 1]} : vector<8x128xf32> to vector<8x32xf32>
    %93 = vector.extract_strided_slice %90 {offsets = [0, 32], sizes = [8, 32], strides = [1, 1]} : vector<8x128xf32> to vector<8x32xf32>
    %94 = vector.extract_strided_slice %91 {offsets = [0, 64], sizes = [8, 32], strides = [1, 1]} : vector<8x128xf32> to vector<8x32xf32>
    %95 = vector.extract_strided_slice %90 {offsets = [0, 96], sizes = [8, 32], strides = [1, 1]} : vector<8x128xf32> to vector<8x32xf32>
    %96 = arith.mulf %93, %80 : vector<8x32xf32>
    %97 = arith.mulf %92, %94 : vector<8x32xf32>
    %98 = arith.addf %96, %97 : vector<8x32xf32>
    %99 = math.tanh %98 : vector<8x32xf32>
    %100 = arith.mulf %95, %99 : vector<8x32xf32>
    %101 = vector.extract_strided_slice %7 {offsets = [40, 0], sizes = [8, 128], strides = [1, 1]} : vector<64x128xf32> to vector<8x128xf32>
    %cst_18 = arith.constant dense<0.000000e+00> : vector<8x128xf32>
    %102 = tpu.matmul %100, %8, %cst_18 {dimension_numbers = #tpu.dot_dimension_numbers<[1], [0], [0], [1], [0, 0, 1, 1], [], []>} : vector<8x32xf32>, vector<32x128xf32>, vector<8x128xf32> -> vector<8x128xf32>
    %103 = arith.addf %101, %102 : vector<8x128xf32>
    %104 = arith.negf %103 : vector<8x128xf32>
    %105 = math.exp %104 : vector<8x128xf32>
    %cst_19 = arith.constant 1.000000e+00 : f32
    %106 = vector.broadcast %cst_19 : f32 to vector<8x128xf32>
    %107 = arith.addf %106, %105 : vector<8x128xf32>
    %108 = arith.divf %106, %107 : vector<8x128xf32>
    %109 = math.tanh %103 : vector<8x128xf32>
    %110 = vector.extract_strided_slice %108 {offsets = [0, 0], sizes = [8, 32], strides = [1, 1]} : vector<8x128xf32> to vector<8x32xf32>
    %111 = vector.extract_strided_slice %108 {offsets = [0, 32], sizes = [8, 32], strides = [1, 1]} : vector<8x128xf32> to vector<8x32xf32>
    %112 = vector.extract_strided_slice %109 {offsets = [0, 64], sizes = [8, 32], strides = [1, 1]} : vector<8x128xf32> to vector<8x32xf32>
    %113 = vector.extract_strided_slice %108 {offsets = [0, 96], sizes = [8, 32], strides = [1, 1]} : vector<8x128xf32> to vector<8x32xf32>
    %114 = arith.mulf %111, %98 : vector<8x32xf32>
    %115 = arith.mulf %110, %112 : vector<8x32xf32>
    %116 = arith.addf %114, %115 : vector<8x32xf32>
    %117 = math.tanh %116 : vector<8x32xf32>
    %118 = arith.mulf %113, %117 : vector<8x32xf32>
    %119 = vector.extract_strided_slice %7 {offsets = [48, 0], sizes = [8, 128], strides = [1, 1]} : vector<64x128xf32> to vector<8x128xf32>
    %cst_20 = arith.constant dense<0.000000e+00> : vector<8x128xf32>
    %120 = tpu.matmul %118, %8, %cst_20 {dimension_numbers = #tpu.dot_dimension_numbers<[1], [0], [0], [1], [0, 0, 1, 1], [], []>} : vector<8x32xf32>, vector<32x128xf32>, vector<8x128xf32> -> vector<8x128xf32>
    %121 = arith.addf %119, %120 : vector<8x128xf32>
    %122 = arith.negf %121 : vector<8x128xf32>
    %123 = math.exp %122 : vector<8x128xf32>
    %cst_21 = arith.constant 1.000000e+00 : f32
    %124 = vector.broadcast %cst_21 : f32 to vector<8x128xf32>
    %125 = arith.addf %124, %123 : vector<8x128xf32>
    %126 = arith.divf %124, %125 : vector<8x128xf32>
    %127 = math.tanh %121 : vector<8x128xf32>
    %128 = vector.extract_strided_slice %126 {offsets = [0, 0], sizes = [8, 32], strides = [1, 1]} : vector<8x128xf32> to vector<8x32xf32>
    %129 = vector.extract_strided_slice %126 {offsets = [0, 32], sizes = [8, 32], strides = [1, 1]} : vector<8x128xf32> to vector<8x32xf32>
    %130 = vector.extract_strided_slice %127 {offsets = [0, 64], sizes = [8, 32], strides = [1, 1]} : vector<8x128xf32> to vector<8x32xf32>
    %131 = vector.extract_strided_slice %126 {offsets = [0, 96], sizes = [8, 32], strides = [1, 1]} : vector<8x128xf32> to vector<8x32xf32>
    %132 = arith.mulf %129, %116 : vector<8x32xf32>
    %133 = arith.mulf %128, %130 : vector<8x32xf32>
    %134 = arith.addf %132, %133 : vector<8x32xf32>
    %135 = math.tanh %134 : vector<8x32xf32>
    %136 = arith.mulf %131, %135 : vector<8x32xf32>
    %137 = vector.extract_strided_slice %7 {offsets = [56, 0], sizes = [8, 128], strides = [1, 1]} : vector<64x128xf32> to vector<8x128xf32>
    %cst_22 = arith.constant dense<0.000000e+00> : vector<8x128xf32>
    %138 = tpu.matmul %136, %8, %cst_22 {dimension_numbers = #tpu.dot_dimension_numbers<[1], [0], [0], [1], [0, 0, 1, 1], [], []>} : vector<8x32xf32>, vector<32x128xf32>, vector<8x128xf32> -> vector<8x128xf32>
    %139 = arith.addf %137, %138 : vector<8x128xf32>
    %140 = arith.negf %139 : vector<8x128xf32>
    %141 = math.exp %140 : vector<8x128xf32>
    %cst_23 = arith.constant 1.000000e+00 : f32
    %142 = vector.broadcast %cst_23 : f32 to vector<8x128xf32>
    %143 = arith.addf %142, %141 : vector<8x128xf32>
    %144 = arith.divf %142, %143 : vector<8x128xf32>
    %145 = math.tanh %139 : vector<8x128xf32>
    %146 = vector.extract_strided_slice %144 {offsets = [0, 0], sizes = [8, 32], strides = [1, 1]} : vector<8x128xf32> to vector<8x32xf32>
    %147 = vector.extract_strided_slice %144 {offsets = [0, 32], sizes = [8, 32], strides = [1, 1]} : vector<8x128xf32> to vector<8x32xf32>
    %148 = vector.extract_strided_slice %145 {offsets = [0, 64], sizes = [8, 32], strides = [1, 1]} : vector<8x128xf32> to vector<8x32xf32>
    %149 = vector.extract_strided_slice %144 {offsets = [0, 96], sizes = [8, 32], strides = [1, 1]} : vector<8x128xf32> to vector<8x32xf32>
    %150 = arith.mulf %147, %134 : vector<8x32xf32>
    %151 = arith.mulf %146, %148 : vector<8x32xf32>
    %152 = arith.addf %150, %151 : vector<8x32xf32>
    %153 = math.tanh %152 : vector<8x32xf32>
    %154 = arith.mulf %149, %153 : vector<8x32xf32>
    %c0_24 = arith.constant 0 : index
    %c0_25 = arith.constant 0 : index
    %155 = vector.load %arg4[%c0_24, %c0_25] : memref<32x12xf32, #tpu.memory_space<vmem>>, vector<32x12xf32>
    %cst_26 = arith.constant dense<0.000000e+00> : vector<8x12xf32>
    %156 = tpu.matmul %154, %155, %cst_26 {dimension_numbers = #tpu.dot_dimension_numbers<[1], [0], [0], [1], [0, 0, 1, 1], [], []>} : vector<8x32xf32>, vector<32x12xf32>, vector<8x12xf32> -> vector<8x12xf32>
    %c0_27 = arith.constant 0 : index
    %c0_28 = arith.constant 0 : index
    %157 = vector.load %arg5[%c0_27, %c0_28] : memref<1x12xf32, #tpu.memory_space<vmem>>, vector<1x12xf32>
    %158 = vector.broadcast %157 : vector<1x12xf32> to vector<8x12xf32>
    %159 = arith.addf %156, %158 : vector<8x12xf32>
    %160 = vector.extract_strided_slice %159 {offsets = [0, 0], sizes = [8, 6], strides = [1, 1]} : vector<8x12xf32> to vector<8x6xf32>
    %cst_29 = arith.constant dense<0xFF800000> : vector<8xf32>
    %161 = vector.multi_reduction <maximumf>, %160, %cst_29 [1] : vector<8x6xf32> to vector<8xf32>
    %162 = vector.shape_cast %161 : vector<8xf32> to vector<8x1xf32>
    %163 = vector.broadcast %162 : vector<8x1xf32> to vector<8x6xf32>
    %164 = arith.subf %160, %163 : vector<8x6xf32>
    %165 = math.exp %164 : vector<8x6xf32>
    %cst_30 = arith.constant dense<0.000000e+00> : vector<8xf32>
    %166 = vector.multi_reduction <add>, %165, %cst_30 [1] : vector<8x6xf32> to vector<8xf32>
    %167 = vector.shape_cast %166 : vector<8xf32> to vector<8x1xf32>
    %168 = vector.broadcast %167 : vector<8x1xf32> to vector<8x6xf32>
    %169 = arith.divf %165, %168 : vector<8x6xf32>
    %c0_31 = arith.constant 0 : index
    %c0_32 = arith.constant 0 : index
    %170 = vector.load %arg6[%c0_31, %c0_32] : memref<8x12xf32, #tpu.memory_space<vmem>>, vector<8x6xf32>
    tpu.vector_store %arg6[%c0_31, %c0_32], %169 {strides = array<i32>} : memref<8x12xf32, #tpu.memory_space<vmem>>, vector<8x6xf32>,
    %171 = vector.extract_strided_slice %159 {offsets = [0, 6], sizes = [8, 6], strides = [1, 1]} : vector<8x12xf32> to vector<8x6xf32>
    %cst_33 = arith.constant dense<0xFF800000> : vector<8xf32>
    %172 = vector.multi_reduction <maximumf>, %171, %cst_33 [1] : vector<8x6xf32> to vector<8xf32>
    %173 = vector.shape_cast %172 : vector<8xf32> to vector<8x1xf32>
    %174 = vector.broadcast %173 : vector<8x1xf32> to vector<8x6xf32>
    %175 = arith.subf %171, %174 : vector<8x6xf32>
    %176 = math.exp %175 : vector<8x6xf32>
    %cst_34 = arith.constant dense<0.000000e+00> : vector<8xf32>
    %177 = vector.multi_reduction <add>, %176, %cst_34 [1] : vector<8x6xf32> to vector<8xf32>
    %178 = vector.shape_cast %177 : vector<8xf32> to vector<8x1xf32>
    %179 = vector.broadcast %178 : vector<8x1xf32> to vector<8x6xf32>
    %180 = arith.divf %176, %179 : vector<8x6xf32>
    %c0_35 = arith.constant 0 : index
    %c6 = arith.constant 6 : index
    %181 = vector.load %arg6[%c0_35, %c6] : memref<8x12xf32, #tpu.memory_space<vmem>>, vector<8x6xf32>
    tpu.vector_store %arg6[%c0_35, %c6], %180 {strides = array<i32>} : memref<8x12xf32, #tpu.memory_space<vmem>>, vector<8x6xf32>,
    return
  }
}

</mosaic_0001>

<bundles_post_ra>
// kernel: tpu_custom_call.1
= control target key start
LH: loop header
LB: loop body
LE: loop exit
PB: predicated region body
PF: predicated region fallthrough
CT: control target
= control target key end

     0   :  { %v834_v2 = vmov 0   ;;  %s1001_s0 = inlined_call_operand.vmem [shape: f32[64,1], index: 0, kind: input, shape index: {}]   ;;  %s1002_s1 = inlined_call_operand.vmem [shape: f32[1,128], index: 1, kind: input, shape index: {}]   ;;  %s1003_s2 = inlined_call_operand.vmem [shape: f32[32,128], index: 2, kind: input, shape index: {}]   ;;  %s1004_s3 = inlined_call_operand.vmem [shape: f32[1,128], index: 3, kind: input, shape index: {}]   ;;  %s1005_s4 = inlined_call_operand.vmem [shape: f32[32,12], index: 4, kind: input, shape index: {}]   ;;  %s1006_s5 = inlined_call_operand.vmem [shape: f32[1,12], index: 5, kind: input, shape index: {}]   ;;  %s1007_s6 = inlined_call_operand.hbm [shape: f32[8,12], index: 6, kind: output, shape index: {}]  }
   0x1   :  { %v99_v0 = vld [vmem:[%s1003_s2 + $0x18] sm:$0xff]  ;;  %v98_v1 = vld [vmem:[%s1003_s2 + $0x10] sm:$0xff]  ;;  %730 = vset.pattern.permute.xlu0 %v834_v2  ;;  %v24_v3 = vld [vmem:[%s1001_s0] sm:$0xff]  ;;  %731 = vset.pattern.permute.xlu2 %v834_v2 }
   0x2   :  { %116 = vmatpush.msra.mxu0 %v99_v0  ;;  %v97_v4 = vld [vmem:[%s1003_s2 + $0x8] sm:$0xff]  ;;  %35 = vperm.xlu0 %730, %v24_v3  }
   0x3   :  { %179 = vmatpush.msra.mxu1 %v99_v0 }
   0x4   :  { %117 = vmatpush.msra.mxu0 %v98_v1 }
   0x5   :  { %11 = vsyncpa [#allocation3], 0  ;;  %v96_v5 = vld [vmem:[%s1003_s2] sm:$0xff]  ;;  %180 = vmatpush.msra.mxu1 %v98_v1  ;;  %242 = vmatpush.msra.mxu2 %v99_v0  ;;  %v835_v6 = vmov 0.0   ;;  %s836_s10 = smov 64   ;;  %v25_v36 = vld [vmem:[%s1001_s0 + $0x8] sm:$0xff] }
   0x6   :  { %118 = vmatpush.msra.mxu0 %v97_v4  ;;  %732 = vset.pattern.permute.xlu1 %v834_v2  ;;  %v893_v7 = vld [vmem:[%s1002_s1] ss:$0 sm:$0xff]  ;;  %s837_s1 = smov 32   ;;  %vm100_vm4 = vcmask 261120  }
   0x7   :  { %181 = vmatpush.msra.mxu1 %v97_v4  ;;  %243 = vmatpush.msra.mxu2 %v98_v1  ;;  %v899_v10 = vld [vmem:[%s1004_s3] ss:$0 sm:$0xff] }
   0x8   :  { %119 = vmatpush.msra.mxu0 %v96_v5  ;;  %305 = vmatpush.msra.mxu3 %v99_v0 }
   0x9   :  { %120 = vmatmul.f32.vlgmr.msra.gmra.mxu0 %v835_v6  ;;  %182 = vmatpush.msra.mxu1 %v96_v5 }
   0xa   :  { %244 = vmatpush.msra.mxu2 %v97_v4  ;;  %306 = vmatpush.msra.mxu3 %v98_v1 }
   0xb   :  { %368 = vmatpush.msrb.mxu0 %v99_v0  ;;  %431 = vmatpush.msrb.mxu1 %v99_v0 }
   0xc   :  { %245 = vmatpush.msra.mxu2 %v96_v5  ;;  %307 = vmatpush.msra.mxu3 %v97_v4 }
   0xd   :  { %369 = vmatpush.msrb.mxu0 %v98_v1  ;;  %432 = vmatpush.msrb.mxu1 %v98_v1 }
   0xe   :  { %308 = vmatpush.msra.mxu3 %v96_v5  ;;  %494 = vmatpush.msrb.mxu2 %v99_v0 }
   0xf   :  { %370 = vmatpush.msrb.mxu0 %v97_v4  ;;  %433 = vmatpush.msrb.mxu1 %v97_v4 }
  0x10   :  { %495 = vmatpush.msrb.mxu2 %v98_v1  ;;  %557 = vmatpush.msrb.mxu3 %v99_v0 }
  0x11   :  { %371 = vmatpush.msrb.mxu0 %v96_v5  ;;  %434 = vmatpush.msrb.mxu1 %v96_v5 }
  0x12   :  { %496 = vmatpush.msrb.mxu2 %v97_v4  ;;  %558 = vmatpush.msrb.mxu3 %v98_v1  ;;  %v26_v1 = vld [vmem:[%s1001_s0 + $0x10] sm:$0xff] }
  0x14   :  { %497 = vmatpush.msrb.mxu2 %v96_v5  ;;  %559 = vmatpush.msrb.mxu3 %v97_v4 }
  0x16   :  { %560 = vmatpush.msrb.mxu3 %v96_v5 }
  0x74   :  { %v36_v8 = vpop.permute.xlu0 %35 }
  0x75   :  { %v76_v9 = vmul.f32 %v893_v7, %v36_v8 }
  0x77   :  { %v88_v11 = vadd.f32 %v899_v10, %v76_v9 }
  0x86   :  { %v121_v12 = vpop.f32.mrf.mxu0 }
  0x87   :  { %v124_v13 = vadd.f32 %v121_v12, %v88_v11 }
  0x89   :  { %736 = vtanh.f32 %v124_v13  ;;  %v708_v15 = vmul.f32 -1.442695, %v124_v13 }
  0x8b   :  { %738 = vpow2.f32 %v708_v15 }
  0x8f   :  { %v737_v14 = vpop.eup %736 }
  0x90   :  { %147 = vrot.lane.b32.xlu0 %v737_v14, %s836_s10 }
  0x91   :  { %v739_v16 = vpop.eup %738 }
  0x92   :  { %v128_v17 = vadd.f32 1.0, %v739_v16 }
  0x94   :  { %740 = vrcp.f32 %v128_v17  ;;  %v140_v23 = vand.u32 2147483648, %v128_v17  ;;  %vm134_vm1 = vweird.f32 %v128_v17  ;;  %v138_v24 = vand.u32 2147483647, %v128_v17 }
  0x96   :  { %v141_v26 = vor.u32 1.1754944e-38, %v140_v23  ;;  %vm139_vm3 = vcmp.eq.f32.partialorder %v138_v24, 8.507059e+37 }
  0x9a   :  { %v741_v18 = vpop.eup %740 }
  0x9b   :  { %v130_v19 = vmul.f32 %v741_v18, %v128_v17  ;;  %vm135_vm0 = vweird.f32 %v741_v18 }
  0x9c   :  { %vm136_vm2 = vmor %vm134_vm1, %vm135_vm0 }
  0x9d   :  { %v131_v20 = vsub.f32 1.0, %v130_v19 }
  0x9f   :  { %v132_v21 = vmul.f32 %v741_v18, %v131_v20 }
  0xa1   :  { %v133_v22 = vadd.f32 %v741_v18, %v132_v21 }
  0xa3   :  { %v137_v25 = vsel %vm136_vm2, %v741_v18, %v133_v22 }
  0xa4   :  { %v142_v28 = vsel %vm139_vm3, %v141_v26, %v137_v25  ;;  %v27_v26 = vld [vmem:[%s1001_s0 + $0x18] sm:$0xff] }
  0xa5   :  { %v145_v30 = vmul.f32 0.0, %v142_v28 }
 0x102   :  { %v148_v27 = vpop.permute.xlu0 %147 }
 0x103   :  { %v150_v29 = vmul.f32 %v148_v27, %v142_v28 }
 0x105   :  { %152 = vrot.lane.b32.xlu1 %v150_v29, %s837_s1 }
 0x177   :  { %v153_v31 = vpop.permute.xlu1 %152 }
 0x178   :  { %v155_v32 = vadd.f32 %v153_v31, %v145_v30 }
 0x17a   :  { %742 = vtanh.f32 %v155_v32 }
 0x180   :  { %v743_v33 = vpop.eup %742 }
 0x181   :  { %158 = vrot.lane.b32.xlu1 %v743_v33, %s836_s10 }
 0x1f3   :  { %v159_v34 = vpop.permute.xlu1 %158 }
 0x1f4   :  { %v161_v35 = vmul.f32 %v159_v34, %v142_v28 }
 0x1f6   :  { %163 = vrot.lane.b32.xlu2 %v161_v35, %s837_s1 }
 0x1fe   :  { %40 = vperm.xlu2 %731, %v25_v36  }
 0x250   :  { %v164_v37 = vpop.permute.xlu2 %163 }
 0x251   :  { %709 = vmatmul.msk.f32.vlgmr.msra.gmra.mxu1 %vm100_vm4, %v164_v37 }
 0x258   :  { %v41_v38 = vpop.permute.xlu2 %40 }
 0x259   :  { %v77_v39 = vmul.f32 %v893_v7, %v41_v38 }
 0x25b   :  { %v89_v40 = vadd.f32 %v899_v10, %v77_v39 }
 0x2ce   :  { %v184_v41 = vpop.f32.mrf.mxu1 }
 0x2cf   :  { %v187_v42 = vadd.f32 %v184_v41, %v89_v40 }
 0x2d1   :  { %744 = vtanh.f32 %v187_v42  ;;  %v710_v44 = vmul.f32 -1.442695, %v187_v42 }
 0x2d3   :  { %746 = vpow2.f32 %v710_v44 }
 0x2d7   :  { %v745_v43 = vpop.eup %744 }
 0x2d8   :  { %210 = vrot.lane.b32.xlu0 %v745_v43, %s836_s10 }
 0x2d9   :  { %v747_v45 = vpop.eup %746 }
 0x2da   :  { %v191_v46 = vadd.f32 1.0, %v747_v45 }
 0x2dc   :  { %748 = vrcp.f32 %v191_v46  ;;  %v203_v52 = vand.u32 2147483648, %v191_v46  ;;  %vm197_vm6 = vweird.f32 %v191_v46  ;;  %v201_v53 = vand.u32 2147483647, %v191_v46 }
 0x2de   :  { %v204_v55 = vor.u32 1.1754944e-38, %v203_v52  ;;  %vm202_vm8 = vcmp.eq.f32.partialorder %v201_v53, 8.507059e+37 }
 0x2e2   :  { %v749_v47 = vpop.eup %748 }
 0x2e3   :  { %v193_v48 = vmul.f32 %v749_v47, %v191_v46  ;;  %vm198_vm5 = vweird.f32 %v749_v47 }
 0x2e4   :  { %vm199_vm7 = vmor %vm197_vm6, %vm198_vm5 }
 0x2e5   :  { %v194_v49 = vsub.f32 1.0, %v193_v48 }
 0x2e7   :  { %v195_v50 = vmul.f32 %v749_v47, %v194_v49 }
 0x2e9   :  { %v196_v51 = vadd.f32 %v749_v47, %v195_v50 }
 0x2eb   :  { %v200_v54 = vsel %vm199_vm7, %v749_v47, %v196_v51 }
 0x2ec   :  { %v205_v57 = vsel %vm202_vm8, %v204_v55, %v200_v54  ;;  %v28_v55 = vld [vmem:[%s1001_s0 + $0x20] sm:$0xff] }
 0x2ed   :  { %v208_v59 = vmul.f32 %v205_v57, %v155_v32 }
 0x34a   :  { %v211_v56 = vpop.permute.xlu0 %210 }
 0x34b   :  { %v213_v58 = vmul.f32 %v211_v56, %v205_v57 }
 0x34d   :  { %215 = vrot.lane.b32.xlu1 %v213_v58, %s837_s1 }
 0x355   :  { %45 = vperm.xlu1 %732, %v26_v1  }
 0x3bf   :  { %v216_v60 = vpop.permute.xlu1 %215 }
 0x3c0   :  { %v218_v61 = vadd.f32 %v216_v60, %v208_v59 }
 0x3c2   :  { %750 = vtanh.f32 %v218_v61 }
 0x3c7   :  { %v46_v3 = vpop.permute.xlu1 %45 }
 0x3c8   :  { %v751_v62 = vpop.eup %750  ;;  %v78_v4 = vmul.f32 %v893_v7, %v46_v3 }
 0x3c9   :  { %221 = vrot.lane.b32.xlu2 %v751_v62, %s836_s10 }
 0x3ca   :  { %v90_v5 = vadd.f32 %v899_v10, %v78_v4 }
 0x423   :  { %v222_v63 = vpop.permute.xlu2 %221 }
 0x424   :  { %v224_v0 = vmul.f32 %v222_v63, %v205_v57 }
 0x426   :  { %226 = vrot.lane.b32.xlu0 %v224_v0, %s837_s1 }
 0x498   :  { %v227_v2 = vpop.permute.xlu0 %226 }
 0x499   :  { %711 = vmatmul.msk.f32.vlgmr.msra.gmra.mxu2 %vm100_vm4, %v227_v2 }
 0x51c   :  { %v247_v6 = vpop.f32.mrf.mxu2 }
 0x51d   :  { %v250_v8 = vadd.f32 %v247_v6, %v90_v5 }
 0x51f   :  { %752 = vtanh.f32 %v250_v8  ;;  %v712_v11 = vmul.f32 -1.442695, %v250_v8 }
 0x521   :  { %754 = vpow2.f32 %v712_v11 }
 0x525   :  { %v753_v9 = vpop.eup %752 }
 0x526   :  { %273 = vrot.lane.b32.xlu2 %v753_v9, %s836_s10 }
 0x527   :  { %v755_v12 = vpop.eup %754 }
 0x528   :  { %v254_v13 = vadd.f32 1.0, %v755_v12 }
 0x52a   :  { %756 = vrcp.f32 %v254_v13  ;;  %v266_v19 = vand.u32 2147483648, %v254_v13  ;;  %vm260_vm10 = vweird.f32 %v254_v13  ;;  %v264_v20 = vand.u32 2147483647, %v254_v13 }
 0x52c   :  { %v267_v22 = vor.u32 1.1754944e-38, %v266_v19  ;;  %vm265_vm12 = vcmp.eq.f32.partialorder %v264_v20, 8.507059e+37 }
 0x530   :  { %v757_v14 = vpop.eup %756 }
 0x531   :  { %v256_v15 = vmul.f32 %v757_v14, %v254_v13  ;;  %vm261_vm9 = vweird.f32 %v757_v14 }
 0x532   :  { %vm262_vm11 = vmor %vm260_vm10, %vm261_vm9 }
 0x533   :  { %v257_v16 = vsub.f32 1.0, %v256_v15 }
 0x535   :  { %v258_v17 = vmul.f32 %v757_v14, %v257_v16 }
 0x537   :  { %v259_v18 = vadd.f32 %v757_v14, %v258_v17 }
 0x539   :  { %v263_v21 = vsel %vm262_vm11, %v757_v14, %v259_v18 }
 0x53a   :  { %v268_v24 = vsel %vm265_vm12, %v267_v22, %v263_v21  ;;  %v29_v22 = vld [vmem:[%s1001_s0 + $0x28] sm:$0xff] }
 0x53b   :  { %v271_v27 = vmul.f32 %v268_v24, %v218_v61 }
 0x580   :  { %v274_v23 = vpop.permute.xlu2 %273 }
 0x581   :  { %v276_v25 = vmul.f32 %v274_v23, %v268_v24 }
 0x583   :  { %278 = vrot.lane.b32.xlu0 %v276_v25, %s837_s1 }
 0x58b   :  { %50 = vperm.xlu0 %730, %v27_v26  }
 0x5f5   :  { %v279_v28 = vpop.permute.xlu0 %278 }
 0x5f6   :  { %v281_v29 = vadd.f32 %v279_v28, %v271_v27 }
 0x5f8   :  { %758 = vtanh.f32 %v281_v29 }
 0x5fd   :  { %v51_v34 = vpop.permute.xlu0 %50 }
 0x5fe   :  { %v759_v30 = vpop.eup %758  ;;  %v79_v35 = vmul.f32 %v893_v7, %v51_v34 }
 0x5ff   :  { %284 = vrot.lane.b32.xlu1 %v759_v30, %s836_s10 }
 0x600   :  { %v91_v36 = vadd.f32 %v899_v10, %v79_v35 }
 0x671   :  { %v285_v31 = vpop.permute.xlu1 %284 }
 0x672   :  { %v287_v32 = vmul.f32 %v285_v31, %v268_v24 }
 0x674   :  { %289 = vrot.lane.b32.xlu2 %v287_v32, %s837_s1 }
 0x6ce   :  { %v290_v33 = vpop.permute.xlu2 %289 }
 0x6cf   :  { %713 = vmatmul.msk.f32.vlgmr.msra.gmra.mxu3 %vm100_vm4, %v290_v33 }
 0x752   :  { %v310_v37 = vpop.f32.mrf.mxu3 }
 0x753   :  { %v313_v38 = vadd.f32 %v310_v37, %v91_v36 }
 0x755   :  { %760 = vtanh.f32 %v313_v38  ;;  %v714_v40 = vmul.f32 -1.442695, %v313_v38 }
 0x757   :  { %762 = vpow2.f32 %v714_v40 }
 0x75b   :  { %v761_v39 = vpop.eup %760 }
 0x75c   :  { %336 = vrot.lane.b32.xlu1 %v761_v39, %s836_s10 }
 0x75d   :  { %v763_v41 = vpop.eup %762 }
 0x75e   :  { %v317_v42 = vadd.f32 1.0, %v763_v41 }
 0x760   :  { %764 = vrcp.f32 %v317_v42  ;;  %v329_v48 = vand.u32 2147483648, %v317_v42  ;;  %vm323_vm14 = vweird.f32 %v317_v42  ;;  %v327_v49 = vand.u32 2147483647, %v317_v42 }
 0x762   :  { %v330_v51 = vor.u32 1.1754944e-38, %v329_v48  ;;  %vm328_vm0 = vcmp.eq.f32.partialorder %v327_v49, 8.507059e+37 }
 0x766   :  { %v765_v43 = vpop.eup %764 }
 0x767   :  { %v319_v44 = vmul.f32 %v765_v43, %v317_v42  ;;  %vm324_vm13 = vweird.f32 %v765_v43 }
 0x768   :  { %vm325_vm15 = vmor %vm323_vm14, %vm324_vm13 }
 0x769   :  { %v320_v45 = vsub.f32 1.0, %v319_v44 }
 0x76b   :  { %v321_v46 = vmul.f32 %v765_v43, %v320_v45 }
 0x76d   :  { %v322_v47 = vadd.f32 %v765_v43, %v321_v46 }
 0x76f   :  { %v326_v50 = vsel %vm325_vm15, %v765_v43, %v322_v47 }
 0x770   :  { %v331_v53 = vsel %vm328_vm0, %v330_v51, %v326_v50  ;;  %v30_v51 = vld [vmem:[%s1001_s0 + $0x30] sm:$0xff] }
 0x771   :  { %v334_v56 = vmul.f32 %v331_v53, %v281_v29 }
 0x7ce   :  { %v337_v52 = vpop.permute.xlu1 %336 }
 0x7cf   :  { %v339_v54 = vmul.f32 %v337_v52, %v331_v53 }
 0x7d1   :  { %341 = vrot.lane.b32.xlu2 %v339_v54, %s837_s1 }
 0x7d9   :  { %55 = vperm.xlu2 %731, %v28_v55  }
 0x82b   :  { %v342_v57 = vpop.permute.xlu2 %341 }
 0x82c   :  { %v344_v58 = vadd.f32 %v342_v57, %v334_v56 }
 0x82e   :  { %766 = vtanh.f32 %v344_v58 }
 0x833   :  { %v56_v63 = vpop.permute.xlu2 %55 }
 0x834   :  { %v767_v59 = vpop.eup %766  ;;  %v80_v0 = vmul.f32 %v893_v7, %v56_v63 }
 0x835   :  { %347 = vrot.lane.b32.xlu0 %v767_v59, %s836_s10 }
 0x836   :  { %v92_v1 = vadd.f32 %v899_v10, %v80_v0 }
 0x8a7   :  { %v348_v60 = vpop.permute.xlu0 %347 }
 0x8a8   :  { %v350_v61 = vmul.f32 %v348_v60, %v331_v53 }
 0x8aa   :  { %352 = vrot.lane.b32.xlu1 %v350_v61, %s837_s1 }
 0x91c   :  { %v353_v62 = vpop.permute.xlu1 %352 }
 0x91d   :  { %715 = vmatmul.msk.f32.vlgmr.msrb.gmra.mxu0 %vm100_vm4, %v353_v62 }
 0x99a   :  { %v373_v2 = vpop.f32.mrf.mxu0 }
 0x99b   :  { %v376_v3 = vadd.f32 %v373_v2, %v92_v1 }
 0x99d   :  { %768 = vtanh.f32 %v376_v3  ;;  %v716_v5 = vmul.f32 -1.442695, %v376_v3 }
 0x99f   :  { %770 = vpow2.f32 %v716_v5 }
 0x9a3   :  { %v769_v4 = vpop.eup %768 }
 0x9a4   :  { %399 = vrot.lane.b32.xlu0 %v769_v4, %s836_s10 }
 0x9a5   :  { %v771_v6 = vpop.eup %770 }
 0x9a6   :  { %v380_v8 = vadd.f32 1.0, %v771_v6 }
 0x9a8   :  { %772 = vrcp.f32 %v380_v8  ;;  %v392_v15 = vand.u32 2147483648, %v380_v8  ;;  %vm386_vm2 = vweird.f32 %v380_v8  ;;  %v390_v16 = vand.u32 2147483647, %v380_v8 }
 0x9aa   :  { %v393_v18 = vor.u32 1.1754944e-38, %v392_v15  ;;  %vm391_vm5 = vcmp.eq.f32.partialorder %v390_v16, 8.507059e+37 }
 0x9ae   :  { %v773_v9 = vpop.eup %772 }
 0x9af   :  { %v382_v11 = vmul.f32 %v773_v9, %v380_v8  ;;  %vm387_vm1 = vweird.f32 %v773_v9 }
 0x9b0   :  { %vm388_vm3 = vmor %vm386_vm2, %vm387_vm1  ;;  %vm662_vm2 = vcmask 97328  }
 0x9b1   :  { %v383_v12 = vsub.f32 1.0, %v382_v11 }
 0x9b3   :  { %v384_v13 = vmul.f32 %v773_v9, %v383_v12 }
 0x9b5   :  { %v385_v14 = vadd.f32 %v773_v9, %v384_v13 }
 0x9b7   :  { %v389_v17 = vsel %vm388_vm3, %v773_v9, %v385_v14  ;;  %vm636_vm3 = vcmask 48128  }
 0x9b8   :  { %v394_v20 = vsel %vm391_vm5, %v393_v18, %v389_v17  ;;  %v31_v18 = vld [vmem:[%s1001_s0 + $0x38] sm:$0xff] }
 0x9b9   :  { %v397_v23 = vmul.f32 %v394_v20, %v344_v58 }
 0xa16   :  { %v400_v19 = vpop.permute.xlu0 %399 }
 0xa17   :  { %v402_v21 = vmul.f32 %v400_v19, %v394_v20 }
 0xa19   :  { %404 = vrot.lane.b32.xlu1 %v402_v21, %s837_s1 }
 0xa21   :  { %60 = vperm.xlu1 %732, %v29_v22  }
 0xa8b   :  { %v405_v24 = vpop.permute.xlu1 %404 }
 0xa8c   :  { %v407_v25 = vadd.f32 %v405_v24, %v397_v23 }
 0xa8e   :  { %774 = vtanh.f32 %v407_v25 }
 0xa93   :  { %v61_v30 = vpop.permute.xlu1 %60 }
 0xa94   :  { %v775_v26 = vpop.eup %774  ;;  %v81_v31 = vmul.f32 %v893_v7, %v61_v30 }
 0xa95   :  { %410 = vrot.lane.b32.xlu2 %v775_v26, %s836_s10 }
 0xa96   :  { %v93_v32 = vadd.f32 %v899_v10, %v81_v31 }
 0xaef   :  { %v411_v27 = vpop.permute.xlu2 %410 }
 0xaf0   :  { %v413_v28 = vmul.f32 %v411_v27, %v394_v20 }
 0xaf2   :  { %415 = vrot.lane.b32.xlu0 %v413_v28, %s837_s1 }
 0xb64   :  { %v416_v29 = vpop.permute.xlu0 %415 }
 0xb65   :  { %717 = vmatmul.msk.f32.vlgmr.msrb.gmra.mxu1 %vm100_vm4, %v416_v29 }
 0xbe2   :  { %v436_v33 = vpop.f32.mrf.mxu1 }
 0xbe3   :  { %v439_v34 = vadd.f32 %v436_v33, %v93_v32 }
 0xbe5   :  { %776 = vtanh.f32 %v439_v34  ;;  %v718_v36 = vmul.f32 -1.442695, %v439_v34 }
 0xbe7   :  { %778 = vpow2.f32 %v718_v36 }
 0xbeb   :  { %v777_v35 = vpop.eup %776 }
 0xbec   :  { %462 = vrot.lane.b32.xlu2 %v777_v35, %s836_s10 }
 0xbed   :  { %v779_v37 = vpop.eup %778 }
 0xbee   :  { %v443_v38 = vadd.f32 1.0, %v779_v37 }
 0xbf0   :  { %780 = vrcp.f32 %v443_v38  ;;  %v455_v44 = vand.u32 2147483648, %v443_v38  ;;  %vm449_vm7 = vweird.f32 %v443_v38  ;;  %v453_v45 = vand.u32 2147483647, %v443_v38 }
 0xbf2   :  { %v456_v47 = vor.u32 1.1754944e-38, %v455_v44  ;;  %vm454_vm9 = vcmp.eq.f32.partialorder %v453_v45, 8.507059e+37 }
 0xbf6   :  { %v781_v39 = vpop.eup %780 }
 0xbf7   :  { %v445_v40 = vmul.f32 %v781_v39, %v443_v38  ;;  %vm450_vm6 = vweird.f32 %v781_v39 }
 0xbf8   :  { %vm451_vm8 = vmor %vm449_vm7, %vm450_vm6 }
 0xbf9   :  { %v446_v41 = vsub.f32 1.0, %v445_v40 }
 0xbfb   :  { %v447_v42 = vmul.f32 %v781_v39, %v446_v41 }
 0xbfd   :  { %v448_v43 = vadd.f32 %v781_v39, %v447_v42 }
 0xbff   :  { %v452_v46 = vsel %vm451_vm8, %v781_v39, %v448_v43 }
 0xc00   :  { %v457_v49 = vsel %vm454_vm9, %v456_v47, %v452_v46 }
 0xc01   :  { %v460_v52 = vmul.f32 %v457_v49, %v407_v25 }
 0xc46   :  { %v463_v48 = vpop.permute.xlu2 %462 }
 0xc47   :  { %v465_v50 = vmul.f32 %v463_v48, %v457_v49 }
 0xc49   :  { %467 = vrot.lane.b32.xlu0 %v465_v50, %s837_s1  ;;  %v605_v50 = vld [vmem:[%s1005_s4 + $0x10] sm:$0xff] }
 0xc51   :  { %65 = vperm.xlu0 %730, %v30_v51   ;;  %v604_v51 = vld [vmem:[%s1005_s4 + $0x8] sm:$0xff] }
 0xcbb   :  { %v468_v53 = vpop.permute.xlu0 %467 }
 0xcbc   :  { %v470_v54 = vadd.f32 %v468_v53, %v460_v52  ;;  %v603_v52 = vld [vmem:[%s1005_s4] sm:$0xff] }
 0xcbe   :  { %782 = vtanh.f32 %v470_v54 }
 0xcc3   :  { %v66_v59 = vpop.permute.xlu0 %65 }
 0xcc4   :  { %v783_v55 = vpop.eup %782  ;;  %v82_v60 = vmul.f32 %v893_v7, %v66_v59 }
 0xcc5   :  { %473 = vrot.lane.b32.xlu1 %v783_v55, %s836_s10 }
 0xcc6   :  { %v94_v61 = vadd.f32 %v899_v10, %v82_v60 }
 0xd37   :  { %v474_v56 = vpop.permute.xlu1 %473 }
 0xd38   :  { %v476_v57 = vmul.f32 %v474_v56, %v457_v49  ;;  %v606_v49 = vld [vmem:[%s1005_s4 + $0x18] sm:$0xff]  ;;  %v735_v56 = vld [vmem:[%s1006_s5] ss:$0 sm:$0xff]  ;;  %s838_s4 = smov 122   ;;  %s839_s5 = smov [#allocation2]  }
 0xd39   :  { %628 = vmatpush.msra.mxu0 %v606_v49  ;;  %s697_s8 = sshll.u32 %s839_s5, 4  ;;  %s698_s8 = int_to_ptr.vmem [resolvable:$true] %s697_s8 }
 0xd3a   :  { %478 = vrot.lane.b32.xlu2 %v476_v57, %s837_s1 }
 0xd3b   :  { %629 = vmatpush.msra.mxu0 %v605_v50 }
 0xd3d   :  { %630 = vmatpush.msra.mxu0 %v604_v51 }
 0xd3f   :  { %631 = vmatpush.msra.mxu0 %v603_v52 }
 0xd94   :  { %v479_v58 = vpop.permute.xlu2 %478 }
 0xd95   :  { %719 = vmatmul.msk.f32.vlgmr.msrb.gmra.mxu2 %vm100_vm4, %v479_v58 }
 0xe18   :  { %v499_v62 = vpop.f32.mrf.mxu2 }
 0xe19   :  { %v502_v63 = vadd.f32 %v499_v62, %v94_v61 }
 0xe1b   :  { %784 = vtanh.f32 %v502_v63  ;;  %v720_v1 = vmul.f32 -1.442695, %v502_v63 }
 0xe1d   :  { %786 = vpow2.f32 %v720_v1 }
 0xe21   :  { %v785_v0 = vpop.eup %784 }
 0xe22   :  { %525 = vrot.lane.b32.xlu1 %v785_v0, %s836_s10 }
 0xe23   :  { %v787_v2 = vpop.eup %786 }
 0xe24   :  { %v506_v3 = vadd.f32 1.0, %v787_v2 }
 0xe26   :  { %788 = vrcp.f32 %v506_v3  ;;  %v518_v11 = vand.u32 2147483648, %v506_v3  ;;  %vm512_vm11 = vweird.f32 %v506_v3  ;;  %v516_v12 = vand.u32 2147483647, %v506_v3 }
 0xe28   :  { %v519_v14 = vor.u32 1.1754944e-38, %v518_v11  ;;  %vm517_vm13 = vcmp.eq.f32.partialorder %v516_v12, 8.507059e+37 }
 0xe2c   :  { %v789_v4 = vpop.eup %788 }
 0xe2d   :  { %v508_v5 = vmul.f32 %v789_v4, %v506_v3  ;;  %vm513_vm10 = vweird.f32 %v789_v4 }
 0xe2e   :  { %vm514_vm12 = vmor %vm512_vm11, %vm513_vm10 }
 0xe2f   :  { %v509_v6 = vsub.f32 1.0, %v508_v5 }
 0xe31   :  { %v510_v8 = vmul.f32 %v789_v4, %v509_v6 }
 0xe33   :  { %v511_v9 = vadd.f32 %v789_v4, %v510_v8 }
 0xe35   :  { %v515_v13 = vsel %vm514_vm12, %v789_v4, %v511_v9 }
 0xe36   :  { %v520_v16 = vsel %vm517_vm13, %v519_v14, %v515_v13 }
 0xe37   :  { %v523_v19 = vmul.f32 %v520_v16, %v470_v54 }
 0xe94   :  { %v526_v15 = vpop.permute.xlu1 %525 }
 0xe95   :  { %v528_v17 = vmul.f32 %v526_v15, %v520_v16 }
 0xe97   :  { %530 = vrot.lane.b32.xlu2 %v528_v17, %s837_s1 }
 0xe9f   :  { %70 = vperm.xlu2 %731, %v31_v18  }
 0xef1   :  { %v531_v20 = vpop.permute.xlu2 %530 }
 0xef2   :  { %v533_v21 = vadd.f32 %v531_v20, %v523_v19 }
 0xef4   :  { %790 = vtanh.f32 %v533_v21 }
 0xef9   :  { %v71_v26 = vpop.permute.xlu2 %70 }
 0xefa   :  { %v791_v22 = vpop.eup %790  ;;  %v83_v27 = vmul.f32 %v893_v7, %v71_v26 }
 0xefb   :  { %536 = vrot.lane.b32.xlu0 %v791_v22, %s836_s10 }
 0xefc   :  { %v95_v28 = vadd.f32 %v899_v10, %v83_v27 }
 0xf6d   :  { %v537_v23 = vpop.permute.xlu0 %536 }
 0xf6e   :  { %v539_v24 = vmul.f32 %v537_v23, %v520_v16 }
 0xf70   :  { %541 = vrot.lane.b32.xlu1 %v539_v24, %s837_s1 }
 0xfe2   :  { %v542_v25 = vpop.permute.xlu1 %541 }
 0xfe3   :  { %721 = vmatmul.msk.f32.vlgmr.msrb.gmra.mxu3 %vm100_vm4, %v542_v25 }
0x1066   :  { %v562_v29 = vpop.f32.mrf.mxu3 }
0x1067   :  { %v565_v30 = vadd.f32 %v562_v29, %v95_v28 }
0x1069   :  { %792 = vtanh.f32 %v565_v30  ;;  %v722_v32 = vmul.f32 -1.442695, %v565_v30 }
0x106b   :  { %794 = vpow2.f32 %v722_v32 }
0x106f   :  { %v793_v31 = vpop.eup %792 }
0x1070   :  { %588 = vrot.lane.b32.xlu0 %v793_v31, %s836_s10 }
0x1071   :  { %v795_v33 = vpop.eup %794 }
0x1072   :  { %v569_v34 = vadd.f32 1.0, %v795_v33 }
0x1074   :  { %796 = vrcp.f32 %v569_v34  ;;  %v581_v7 = vand.u32 2147483648, %v569_v34  ;;  %vm575_vm15 = vweird.f32 %v569_v34  ;;  %v579_v10 = vand.u32 2147483647, %v569_v34 }
0x1076   :  { %v582_v41 = vor.u32 1.1754944e-38, %v581_v7  ;;  %vm580_vm1 = vcmp.eq.f32.partialorder %v579_v10, 8.507059e+37 }
0x107a   :  { %v797_v35 = vpop.eup %796 }
0x107b   :  { %v571_v36 = vmul.f32 %v797_v35, %v569_v34  ;;  %vm576_vm14 = vweird.f32 %v797_v35 }
0x107c   :  { %vm577_vm0 = vmor %vm575_vm15, %vm576_vm14 }
0x107d   :  { %v572_v37 = vsub.f32 1.0, %v571_v36 }
0x107f   :  { %v573_v38 = vmul.f32 %v797_v35, %v572_v37 }
0x1081   :  { %v574_v39 = vadd.f32 %v797_v35, %v573_v38 }
0x1083   :  { %v578_v40 = vsel %vm577_vm0, %v797_v35, %v574_v39 }
0x1084   :  { %v583_v43 = vsel %vm580_vm1, %v582_v41, %v578_v40 }
0x1085   :  { %v586_v45 = vmul.f32 %v583_v43, %v533_v21 }
0x10e2   :  { %v589_v42 = vpop.permute.xlu0 %588 }
0x10e3   :  { %v591_v44 = vmul.f32 %v589_v42, %v583_v43 }
0x10e5   :  { %593 = vrot.lane.b32.xlu1 %v591_v44, %s837_s1 }
0x1157   :  { %v594_v46 = vpop.permute.xlu1 %593 }
0x1158   :  { %v596_v47 = vadd.f32 %v594_v46, %v586_v45 }
0x115a   :  { %798 = vtanh.f32 %v596_v47 }
0x1160   :  { %v799_v48 = vpop.eup %798 }
0x1161   :  { %599 = vrot.lane.b32.xlu2 %v799_v48, %s836_s10 }
0x11bb   :  { %v600_v53 = vpop.permute.xlu2 %599 }
0x11bc   :  { %v602_v54 = vmul.f32 %v600_v53, %v583_v43 }
0x11be   :  { %612 = vrot.lane.b32.xlu0 %v602_v54, %s837_s1  ;;  %s699_s1 = sshll.u32 %s1007_s6, 4  ;;  %s700_s1 = int_to_ptr.hbm [resolvable:$true] %s699_s1 }
0x1230   :  { %v613_v55 = vpop.permute.xlu0 %612 }
0x1231   :  { %723 = vmatmul.msk.f32.vlgmr.msra.gmra.mxu0 %vm100_vm4, %v613_v55 }
0x12ae   :  { %v633_v57 = vpop.f32.mrf.mxu0 }
0x12af   :  { %v634_v58 = vadd.f32 %v735_v56, %v633_v57 }
0x12b1   :  { %v663_v59 = vsel %vm662_vm2, %v634_v58, -inf  ;;  %v637_v60 = vsel %vm636_vm3, %v634_v58, -inf }
0x12b2   :  { %664 = vmax.xlane.f32.xlu1 %v663_v59  ;;  %638 = vmax.xlane.f32.xlu2 %v637_v60 }
0x1325   :  { %v665_v61 = vpop.xlane.xlu1 %664  ;;  %v639_v1 = vpop.xlane.xlu2 %638 }
0x1326   :  { %v666_v62 = vsub.f32 %v634_v58, %v665_v61  ;;  %v640_v2 = vsub.f32 %v634_v58, %v639_v1 }
0x1328   :  { %v667_v63 = vmul.f32 1.442695, %v666_v62  ;;  %v641_v3 = vmul.f32 1.442695, %v640_v2 }
0x132a   :  { %800 = vpow2.f32 %v667_v63 }
0x132b   :  { %802 = vpow2.f32 %v641_v3 }
0x1330   :  { %v801_v0 = vpop.eup %800 }
0x1331   :  { %670 = vrot.lane.b32.xlu0 %v801_v0, %s838_s4  ;;  %v803_v4 = vpop.eup %802 }
0x1332   :  { %v643_v5 = vsel %vm636_vm3, %v803_v4, 0.0 }
0x135b   :  { %644 = vadd.xlane.f32.xlu0 %v643_v5 }
0x13a3   :  { %v671_v6 = vpop.permute.xlu0 %670 }
0x13a4   :  { %v673_v8 = vsel %vm636_vm3, %v671_v6, 0.0 }
0x13a5   :  { %674 = vadd.xlane.f32.xlu2 %v673_v8 }
0x13ce   :  { %v645_v9 = vpop.xlane.xlu0 %644 }
0x13cf   :  { %804 = vrcp.f32 %v645_v9  ;;  %v657_v14 = vand.u32 2147483648, %v645_v9  ;;  %v655_v16 = vand.u32 2147483647, %v645_v9  ;;  %vm651_vm5 = vweird.f32 %v645_v9 }
0x13d1   :  { %v658_v18 = vor.u32 1.1754944e-38, %v657_v14  ;;  %vm656_vm7 = vcmp.eq.f32.partialorder %v655_v16, 8.507059e+37 }
0x13d5   :  { %v805_v11 = vpop.eup %804 }
0x13d6   :  { %v647_v12 = vmul.f32 %v805_v11, %v645_v9  ;;  %vm652_vm4 = vweird.f32 %v805_v11 }
0x13d7   :  { %vm653_vm6 = vmor %vm651_vm5, %vm652_vm4 }
0x13d8   :  { %v648_v13 = vsub.f32 1.0, %v647_v12 }
0x13da   :  { %v649_v15 = vmul.f32 %v805_v11, %v648_v13 }
0x13dc   :  { %v650_v17 = vadd.f32 %v805_v11, %v649_v15 }
0x13de   :  { %v654_v19 = vsel %vm653_vm6, %v805_v11, %v650_v17 }
0x13df   :  { %v659_v20 = vsel %vm656_vm7, %v658_v18, %v654_v19 }
0x13e0   :  { %v660_v21 = vmul.f32 %v803_v4, %v659_v20 }
0x13e2   :  { %661 = vst.msk [vmem:[#allocation2] sm:$0xff] %vm636_vm3, %v660_v21 }
0x1418   :  { %v675_v22 = vpop.xlane.xlu2 %674 }
0x1419   :  { %806 = vrcp.f32 %v675_v22  ;;  %v687_v26 = vand.u32 2147483648, %v675_v22  ;;  %v685_v28 = vand.u32 2147483647, %v675_v22  ;;  %vm681_vm9 = vweird.f32 %v675_v22 }
0x141b   :  { %v688_v30 = vor.u32 1.1754944e-38, %v687_v26  ;;  %vm686_vm11 = vcmp.eq.f32.partialorder %v685_v28, 8.507059e+37 }
0x141f   :  { %v807_v23 = vpop.eup %806 }
0x1420   :  { %v677_v24 = vmul.f32 %v807_v23, %v675_v22  ;;  %vm682_vm8 = vweird.f32 %v807_v23 }
0x1421   :  { %vm683_vm10 = vmor %vm681_vm9, %vm682_vm8 }
0x1422   :  { %v678_v25 = vsub.f32 1.0, %v677_v24 }
0x1424   :  { %v679_v27 = vmul.f32 %v807_v23, %v678_v25 }
0x1426   :  { %v680_v29 = vadd.f32 %v807_v23, %v679_v27 }
0x1428   :  { %v684_v31 = vsel %vm683_vm10, %v807_v23, %v680_v29 }
0x1429   :  { %v689_v32 = vsel %vm686_vm11, %v688_v30, %v684_v31 }
0x142a   :  { %v690_v33 = vmul.f32 %v801_v0, %v689_v32 }
0x142c   :  { %691 = vst.msk [vmem:[#allocation2] sm:$0xff] %vm662_vm2, %v690_v33 }
0x142d   :  { %702 = dma.vmem_to_hbm [thread:$0]  %s698_s8, 128, %s700_s1, [#allocation3]  }
0x142e   :  { %832 = dma.done.wait [#allocation3], 128  }
0x142f   :  { %833 = vsyncadd [#allocation3], 4294967168 }
0x1430   :  { %707 = vsyncpa [#allocation3], 1 }

</bundles_post_ra>
